<compile_context>
chip_gen: v7x
topology: tpu7x:2x2x1
jax: 0.10.0
libtpu: 0.0.40
codegen_flags: <defaults>
</compile_context>

<pallas_src>
import math
import functools

import jax
import jax.numpy as jnp
from jax import lax
from jax.experimental import pallas as pl
from jax.experimental.pallas import tpu as pltpu


def _round_up(x, m):
    return ((x + m - 1) // m) * m


# ----------------------------------------------------------------------------
# Kernel
# ----------------------------------------------------------------------------
def dueling_kernel(x_ref, w_in_ref, b_in_ref,
                   w_hid_ref, b_hid_ref,
                   w_q_ref, b_q_ref,
                   q_ref, *, n_hidden):
    """One batch tile of the full MLP; dueling head pre-folded into w_q/b_q."""
    # input layer + ReLU  (MXU, f32 accumulation)
    h = jnp.dot(x_ref[...], w_in_ref[...], preferred_element_type=jnp.float32)
    h = jnp.maximum(h + b_in_ref[...], 0.0)

    # hidden layers + ReLU (static unroll; weights are VMEM-resident)
    for l in range(n_hidden):
        h = jnp.dot(h, w_hid_ref[l], preferred_element_type=jnp.float32)
        h = jnp.maximum(h + b_hid_ref[l], 0.0)

    # folded dueling head: q = h @ W_q + b_q  (V + A - mean(A) baked into W_q)
    q = jnp.dot(h, w_q_ref[...], preferred_element_type=jnp.float32)
    q_ref[...] = (q + b_q_ref[...]).astype(q_ref.dtype)


# ----------------------------------------------------------------------------
# Wrapper
# ----------------------------------------------------------------------------
def dueling_forward(x, kp):
    """x: (B, input_dim) f32.  kp: padded/fused params from prepare_params."""
    meta = kp["meta"]
    B, input_dim = x.shape
    IN_PAD, H_PAD, HEAD_PAD = meta["in_pad"], meta["h_pad"], meta["head_pad"]
    n_hidden, output_dim = meta["n_hidden"], meta["output_dim"]

    # batch tiling: keep tiles <=128 rows, sublane-aligned (multiple of 8)
    TILE_B = min(128, _round_up(max(B, 1), 8))
    B_pad = _round_up(B, TILE_B)

    xp = jnp.pad(x.astype(jnp.float32),
                 ((0, B_pad - B), (0, IN_PAD - input_dim)))

    n_hid_blk = kp["w_hid"].shape[0]          # >= 1 (dummy layer if depth == 1)
    grid = (B_pad // TILE_B,)

    kernel = functools.partial(dueling_kernel, n_hidden=n_hidden)

    flops = 2 * B_pad * (IN_PAD * H_PAD
                         + n_hidden * H_PAD * H_PAD
                         + H_PAD * HEAD_PAD)
    bytes_accessed = 4 * (xp.size
                          + kp["w_in"].size + kp["b_in"].size
                          + kp["w_hid"].size + kp["b_hid"].size
                          + kp["w_q"].size + kp["b_q"].size
                          + B_pad * HEAD_PAD)

    q_pad = pl.pallas_call(
        kernel,
        out_shape=jax.ShapeDtypeStruct((B_pad, HEAD_PAD), jnp.float32),
        grid_spec=pltpu.PrefetchScalarGridSpec(
            num_scalar_prefetch=0,
            grid=grid,
            in_specs=[
                pl.BlockSpec((TILE_B, IN_PAD), lambda i: (i, 0)),        # x tile
                pl.BlockSpec((IN_PAD, H_PAD), lambda i: (0, 0)),         # w_in
                pl.BlockSpec((1, H_PAD), lambda i: (0, 0)),              # b_in
                pl.BlockSpec((n_hid_blk, H_PAD, H_PAD),                  # w_hid
                             lambda i: (0, 0, 0)),
                pl.BlockSpec((n_hid_blk, H_PAD), lambda i: (0, 0)),      # b_hid
                pl.BlockSpec((H_PAD, HEAD_PAD), lambda i: (0, 0)),       # w_q
                pl.BlockSpec((1, HEAD_PAD), lambda i: (0, 0)),           # b_q
            ],
            out_specs=pl.BlockSpec((TILE_B, HEAD_PAD), lambda i: (i, 0)),
        ),
        compiler_params=pltpu.CompilerParams(
            dimension_semantics=("parallel",)),
        cost_estimate=pl.CostEstimate(flops=flops, transcendentals=0,
                                      bytes_accessed=bytes_accessed),
    )(xp, kp["w_in"], kp["b_in"], kp["w_hid"], kp["b_hid"],
      kp["w_q"], kp["b_q"])

    # strip batch padding and head lane padding
    return q_pad[:B, :output_dim]


# ----------------------------------------------------------------------------
# Parameter construction (torch.nn.Linear-style init), padding & head folding
# ----------------------------------------------------------------------------
def init_params(key, input_dim, hidden_dim, output_dim, depth):
    """Unpadded params mimicking torch.nn.Linear (W transposed to (in, out))."""
    keys = jax.random.split(key, 2 * (depth + 2))
    k = iter(keys)

    def linear(fan_in, fan_out):
        bound = 1.0 / math.sqrt(fan_in)
        w = jax.random.uniform(next(k), (fan_out, fan_in), jnp.float32, -bound, bound)
        b = jax.random.uniform(next(k), (fan_out,), jnp.float32, -bound, bound)
        return w.T, b.reshape(1, fan_out)          # (in, out), (1, out)

    w_in, b_in = linear(input_dim, hidden_dim)

    w_hid_list, b_hid_list = [], []
    for _ in range(depth - 1):
        w, b = linear(hidden_dim, hidden_dim)
        w_hid_list.append(w)
        b_hid_list.append(b[0])
    if depth - 1 > 0:
        w_hid = jnp.stack(w_hid_list, axis=0)      # (depth-1, H, H)
        b_hid = jnp.stack(b_hid_list, axis=0)      # (depth-1, H)
    else:
        w_hid = jnp.zeros((0, hidden_dim, hidden_dim), jnp.float32)
        b_hid = jnp.zeros((0, hidden_dim), jnp.float32)

    w_val, b_val = linear(hidden_dim, 1)
    w_adv, b_adv = linear(hidden_dim, output_dim)

    return dict(w_in=w_in, b_in=b_in, w_hid=w_hid, b_hid=b_hid,
                w_val=w_val, b_val=b_val, w_adv=w_adv, b_adv=b_adv)


def prepare_params(p, input_dim, hidden_dim, output_dim):
    """Pad feature dims to multiples of 128 and fold the dueling head.

    q = V + A - mean(A) is linear in the final hidden activation, so:
        W_q = W_adv + w_val*1^T - mean_col(W_adv)*1^T
        b_q = b_adv + b_val     - mean(b_adv)
    """
    IN_PAD = _round_up(input_dim, 128)
    H_PAD = _round_up(hidden_dim, 128)
    HEAD_PAD = _round_up(output_dim, 128)

    def pad2(a, rows, cols):
        return jnp.pad(a, ((0, rows - a.shape[0]), (0, cols - a.shape[1])))

    w_in = pad2(p["w_in"], IN_PAD, H_PAD)                        # (IN_PAD, H_PAD)
    b_in = pad2(p["b_in"], 1, H_PAD)                             # (1, H_PAD)

    n_hidden = p["w_hid"].shape[0]
    if n_hidden > 0:
        w_hid = jnp.stack([pad2(p["w_hid"][l], H_PAD, H_PAD)
                           for l in range(n_hidden)], axis=0)    # (L, H_PAD, H_PAD)
        b_hid = jnp.stack([jnp.pad(p["b_hid"][l], (0, H_PAD - hidden_dim))
                           for l in range(n_hidden)], axis=0)    # (L, H_PAD)
    else:
        # dummy (unused) layer so BlockSpec shapes stay non-degenerate
        w_hid = jnp.zeros((1, H_PAD, H_PAD), jnp.float32)
        b_hid = jnp.zeros((1, H_PAD), jnp.float32)

    # fold value + advantage + (-mean advantage) into one head matmul
    w_adv, b_adv = p["w_adv"], p["b_adv"]            # (H, O), (1, O)
    w_val, b_val = p["w_val"], p["b_val"]            # (H, 1), (1, 1)
    w_q = w_adv + w_val - jnp.mean(w_adv, axis=1, keepdims=True)     # (H, O)
    b_q = b_adv + b_val - jnp.mean(b_adv, axis=1, keepdims=True)     # (1, O)

    w_q = pad2(w_q, H_PAD, HEAD_PAD)                 # padded cols are zero
    b_q = pad2(b_q, 1, HEAD_PAD)

    return dict(w_in=w_in, b_in=b_in, w_hid=w_hid, b_hid=b_hid,
                w_q=w_q, b_q=b_q,
                meta=dict(input_dim=input_dim, hidden_dim=hidden_dim,
                          output_dim=output_dim, n_hidden=n_hidden,
                          in_pad=IN_PAD, h_pad=H_PAD, head_pad=HEAD_PAD))


def reference_forward(x, p):
    """Pure-JAX reference matching the PyTorch forward (unpadded params)."""
    h = jnp.maximum(x @ p["w_in"] + p["b_in"], 0.0)
    for l in range(p["w_hid"].shape[0]):
        h = jnp.maximum(h @ p["w_hid"][l] + p["b_hid"][l], 0.0)
    adv = h @ p["w_adv"] + p["b_adv"]
    val = h @ p["w_val"] + p["b_val"]
    return val + adv - jnp.mean(adv, axis=-1, keepdims=True)


if __name__ == "__main__":
    # Small shapes consistent with the module: x is (batch, input_dim).
    batch, input_dim, hidden_dim, output_dim, depth = 8, 16, 32, 8, 3

    key = jax.random.PRNGKey(0)
    kx, kp = jax.random.split(key)
    x = jax.random.normal(kx, (batch, input_dim), jnp.float32)

    params = init_params(kp, input_dim, hidden_dim, output_dim, depth)
    kparams = prepare_params(params, input_dim, hidden_dim, output_dim)

    q = dueling_forward(x, kparams)
    q = jax.block_until_ready(q)

    q_ref = reference_forward(x, params)
    assert q.shape == (batch, output_dim)
    assert jnp.allclose(q, q_ref, atol=1e-4, rtol=1e-4)

    print("KERNEL_OK")
</pallas_src>

<mosaic_0001>
module attributes {stable_mosaic.version = 11 : i64} {
  func.func @dueling_kernel(%arg0: i32, %arg1: memref<8x128xf32, #tpu.memory_space<vmem>>, %arg2: memref<128x128xf32, #tpu.memory_space<vmem>>, %arg3: memref<1x128xf32, #tpu.memory_space<vmem>>, %arg4: memref<2x128x128xf32, #tpu.memory_space<vmem>>, %arg5: memref<2x128xf32, #tpu.memory_space<vmem>>, %arg6: memref<128x128xf32, #tpu.memory_space<vmem>>, %arg7: memref<1x128xf32, #tpu.memory_space<vmem>>, %arg8: memref<8x128xf32, #tpu.memory_space<vmem>>) attributes {dimension_semantics = [#tpu.dimension_semantics<parallel>], iteration_bounds = array<i64: 1>, scalar_prefetch = 0 : i64, scratch_operands = 0 : i64, tpu.core_type = #tpu.core_type<tc>, window_params = [{transform_indices = @transform_0, window_bounds = array<i64: 8, 128>}, {pipeline_mode = #tpu.pipeline_mode<synchronous>, transform_indices = @transform_1, window_bounds = array<i64: 128, 128>}, {pipeline_mode = #tpu.pipeline_mode<synchronous>, transform_indices = @transform_2, window_bounds = array<i64: 1, 128>}, {pipeline_mode = #tpu.pipeline_mode<synchronous>, transform_indices = @transform_3, window_bounds = array<i64: 2, 128, 128>}, {pipeline_mode = #tpu.pipeline_mode<synchronous>, transform_indices = @transform_4, window_bounds = array<i64: 2, 128>}, {pipeline_mode = #tpu.pipeline_mode<synchronous>, transform_indices = @transform_5, window_bounds = array<i64: 128, 128>}, {pipeline_mode = #tpu.pipeline_mode<synchronous>, transform_indices = @transform_6, window_bounds = array<i64: 1, 128>}, {transform_indices = @transform_7, window_bounds = array<i64: 8, 128>}]} {
    %c0 = arith.constant 0 : index
    %c0_0 = arith.constant 0 : index
    %0 = vector.load %arg1[%c0, %c0_0] : memref<8x128xf32, #tpu.memory_space<vmem>>, vector<8x128xf32>
    %c0_1 = arith.constant 0 : index
    %c0_2 = arith.constant 0 : index
    %1 = vector.load %arg2[%c0_1, %c0_2] : memref<128x128xf32, #tpu.memory_space<vmem>>, vector<128x128xf32>
    %cst = arith.constant dense<0.000000e+00> : vector<8x128xf32>
    %2 = tpu.matmul %0, %1, %cst {dimension_numbers = #tpu.dot_dimension_numbers<[1], [0], [0], [1], [0, 0, 1, 1], [], []>} : vector<8x128xf32>, vector<128x128xf32>, vector<8x128xf32> -> vector<8x128xf32>
    %c0_3 = arith.constant 0 : index
    %c0_4 = arith.constant 0 : index
    %3 = vector.load %arg3[%c0_3, %c0_4] : memref<1x128xf32, #tpu.memory_space<vmem>>, vector<1x128xf32>
    %4 = vector.broadcast %3 : vector<1x128xf32> to vector<8x128xf32>
    %5 = arith.addf %2, %4 : vector<8x128xf32>
    %cst_5 = arith.constant 0.000000e+00 : f32
    %6 = vector.broadcast %cst_5 : f32 to vector<8x128xf32>
    %7 = arith.maximumf %5, %6 : vector<8x128xf32>
    %c0_6 = arith.constant 0 : index
    %c0_7 = arith.constant 0 : index
    %c0_8 = arith.constant 0 : index
    %8 = vector.load %arg4[%c0_6, %c0_7, %c0_8] : memref<2x128x128xf32, #tpu.memory_space<vmem>>, vector<1x128x128xf32>
    %9 = vector.shape_cast %8 : vector<1x128x128xf32> to vector<128x128xf32>
    %cst_9 = arith.constant dense<0.000000e+00> : vector<8x128xf32>
    %10 = tpu.matmul %7, %9, %cst_9 {dimension_numbers = #tpu.dot_dimension_numbers<[1], [0], [0], [1], [0, 0, 1, 1], [], []>} : vector<8x128xf32>, vector<128x128xf32>, vector<8x128xf32> -> vector<8x128xf32>
    %c0_10 = arith.constant 0 : index
    %c0_11 = arith.constant 0 : index
    %11 = vector.load %arg5[%c0_10, %c0_11] : memref<2x128xf32, #tpu.memory_space<vmem>>, vector<1x128xf32>
    %12 = vector.shape_cast %11 : vector<1x128xf32> to vector<128xf32>
    %13 = vector.shape_cast %12 : vector<128xf32> to vector<1x128xf32>
    %14 = vector.broadcast %13 : vector<1x128xf32> to vector<8x128xf32>
    %15 = arith.addf %10, %14 : vector<8x128xf32>
    %cst_12 = arith.constant 0.000000e+00 : f32
    %16 = vector.broadcast %cst_12 : f32 to vector<8x128xf32>
    %17 = arith.maximumf %15, %16 : vector<8x128xf32>
    %c1 = arith.constant 1 : index
    %c0_13 = arith.constant 0 : index
    %c0_14 = arith.constant 0 : index
    %18 = vector.load %arg4[%c1, %c0_13, %c0_14] : memref<2x128x128xf32, #tpu.memory_space<vmem>>, vector<1x128x128xf32>
    %19 = vector.shape_cast %18 : vector<1x128x128xf32> to vector<128x128xf32>
    %cst_15 = arith.constant dense<0.000000e+00> : vector<8x128xf32>
    %20 = tpu.matmul %17, %19, %cst_15 {dimension_numbers = #tpu.dot_dimension_numbers<[1], [0], [0], [1], [0, 0, 1, 1], [], []>} : vector<8x128xf32>, vector<128x128xf32>, vector<8x128xf32> -> vector<8x128xf32>
    %c1_16 = arith.constant 1 : index
    %c0_17 = arith.constant 0 : index
    %21 = vector.load %arg5[%c1_16, %c0_17] : memref<2x128xf32, #tpu.memory_space<vmem>>, vector<1x128xf32>
    %22 = vector.shape_cast %21 : vector<1x128xf32> to vector<128xf32>
    %23 = vector.shape_cast %22 : vector<128xf32> to vector<1x128xf32>
    %24 = vector.broadcast %23 : vector<1x128xf32> to vector<8x128xf32>
    %25 = arith.addf %20, %24 : vector<8x128xf32>
    %cst_18 = arith.constant 0.000000e+00 : f32
    %26 = vector.broadcast %cst_18 : f32 to vector<8x128xf32>
    %27 = arith.maximumf %25, %26 : vector<8x128xf32>
    %c0_19 = arith.constant 0 : index
    %c0_20 = arith.constant 0 : index
    %28 = vector.load %arg6[%c0_19, %c0_20] : memref<128x128xf32, #tpu.memory_space<vmem>>, vector<128x128xf32>
    %cst_21 = arith.constant dense<0.000000e+00> : vector<8x128xf32>
    %29 = tpu.matmul %27, %28, %cst_21 {dimension_numbers = #tpu.dot_dimension_numbers<[1], [0], [0], [1], [0, 0, 1, 1], [], []>} : vector<8x128xf32>, vector<128x128xf32>, vector<8x128xf32> -> vector<8x128xf32>
    %c0_22 = arith.constant 0 : index
    %c0_23 = arith.constant 0 : index
    %30 = vector.load %arg7[%c0_22, %c0_23] : memref<1x128xf32, #tpu.memory_space<vmem>>, vector<1x128xf32>
    %31 = vector.broadcast %30 : vector<1x128xf32> to vector<8x128xf32>
    %32 = arith.addf %29, %31 : vector<8x128xf32>
    %c0_24 = arith.constant 0 : index
    %c0_25 = arith.constant 0 : index
    %33 = vector.load %arg8[%c0_24, %c0_25] : memref<8x128xf32, #tpu.memory_space<vmem>>, vector<8x128xf32>
    tpu.vector_store %arg8[%c0_24, %c0_25], %32 {strides = array<i32>} : memref<8x128xf32, #tpu.memory_space<vmem>>, vector<8x128xf32>,
    return
  }
  func.func @transform_0(%arg0: i32) -> (i32, i32) {
    %c0_i32 = arith.constant 0 : i32
    %c0_i32_0 = arith.constant 0 : i32
    return %arg0, %c0_i32 : i32, i32
  }
  func.func @transform_1(%arg0: i32) -> (i32, i32) {
    %c0_i32 = arith.constant 0 : i32
    %c0_i32_0 = arith.constant 0 : i32
    %c0_i32_1 = arith.constant 0 : i32
    return %c0_i32, %c0_i32_0 : i32, i32
  }
  func.func @transform_2(%arg0: i32) -> (i32, i32) {
    %c0_i32 = arith.constant 0 : i32
    %c0_i32_0 = arith.constant 0 : i32
    %c0_i32_1 = arith.constant 0 : i32
    return %c0_i32, %c0_i32_0 : i32, i32
  }
  func.func @transform_3(%arg0: i32) -> (i32, i32, i32) {
    %c0_i32 = arith.constant 0 : i32
    %c0_i32_0 = arith.constant 0 : i32
    %c0_i32_1 = arith.constant 0 : i32
    %c0_i32_2 = arith.constant 0 : i32
    return %c0_i32, %c0_i32_0, %c0_i32_1 : i32, i32, i32
  }
  func.func @transform_4(%arg0: i32) -> (i32, i32) {
    %c0_i32 = arith.constant 0 : i32
    %c0_i32_0 = arith.constant 0 : i32
    %c0_i32_1 = arith.constant 0 : i32
    return %c0_i32, %c0_i32_0 : i32, i32
  }
  func.func @transform_5(%arg0: i32) -> (i32, i32) {
    %c0_i32 = arith.constant 0 : i32
    %c0_i32_0 = arith.constant 0 : i32
    %c0_i32_1 = arith.constant 0 : i32
    return %c0_i32, %c0_i32_0 : i32, i32
  }
  func.func @transform_6(%arg0: i32) -> (i32, i32) {
    %c0_i32 = arith.constant 0 : i32
    %c0_i32_0 = arith.constant 0 : i32
    %c0_i32_1 = arith.constant 0 : i32
    return %c0_i32, %c0_i32_0 : i32, i32
  }
  func.func @transform_7(%arg0: i32) -> (i32, i32) {
    %c0_i32 = arith.constant 0 : i32
    %c0_i32_0 = arith.constant 0 : i32
    return %arg0, %c0_i32 : i32, i32
  }
}

</mosaic_0001>

<bundles_post_ra>
// kernel: tpu_custom_call.1
= control target key start
LH: loop header
LB: loop body
LE: loop exit
PB: predicated region body
PF: predicated region fallthrough
CT: control target
= control target key end

     0   :  { %12 = vsyncpa [#allocation3], 0  ;;  %s1078_s0 = inlined_call_operand.hbm [shape: f32[8,128], index: 0, kind: input, shape index: {}]   ;;  %s1079_s1 = inlined_call_operand.hbm [shape: f32[128,128], index: 1, kind: input, shape index: {}]   ;;  %s1080_s2 = inlined_call_operand.vmem [shape: f32[1,128], index: 2, kind: input, shape index: {}]   ;;  %s1081_s3 = inlined_call_operand.hbm [shape: f32[2,128,128], index: 3, kind: input, shape index: {}]   ;;  %s1082_s4 = inlined_call_operand.vmem [shape: f32[2,128], index: 4, kind: input, shape index: {}]   ;;  %s1083_s5 = inlined_call_operand.hbm [shape: f32[128,128], index: 5, kind: input, shape index: {}]   ;;  %s1084_s6 = inlined_call_operand.vmem [shape: f32[1,128], index: 6, kind: input, shape index: {}]   ;;  %s1085_s7 = inlined_call_operand.hbm [shape: f32[8,128], index: 7, kind: output, shape index: {}]  }
   0x1   :  { %13 = vsyncpa [#allocation6], 0 }
   0x2   :  { %14 = vsyncpa [#allocation9], 0 }
   0x3   :  { %15 = vsyncpa [#allocation4], 0  ;;  %s907_s24 = smov [#allocation5]   ;;  %s789_s28 = scalar_lea.hbm %s1079_s1, 2048 }
   0x4   :  { %s31_s25 = sshll.u32 %s907_s24, 4  ;;  %p790_p0 = scmp.ne.s32.totalorder %s1079_s1, %s789_s28  ;;  %s32_s25 = int_to_ptr.vmem [resolvable:$true] %s31_s25 }
   0x5   :  { %p793_p1 = scmp.lt.u32.totalorder %s789_s28, %s1079_s1 }
   0x7   :  { %p795_p2 = pnand %p793_p1, %p790_p0 }
   0x9   :  { %798 = shalt.err (!%p795_p2)
}
   0xa   :  { %s799_s10 = scalar_lea.vmem %s32_s25, 2048  ;;  %p804_p4 = scmp.lt.s32.totalorder %s32_s25, %s32_s25 }
   0xb   :  { %p800_p3 = scmp.ne.s32.totalorder %s32_s25, %s799_s10  ;;  %p805_p5 = scmp.lt.s32.totalorder %s799_s10, %s799_s10 }
   0xd   :  { %p806_p6 = por %p805_p5, %p804_p4 }
   0xf   :  { %p807_p7 = pnand %p806_p6, %p800_p3 }
  0x11   :  { %810 = shalt.err (!%p807_p7)
}
  0x12   :  { %s908_s11 = smov 128   ;;  %s909_s12 = smov 8  }
  0x13   :  { %37 = dma.hbm_to_vmem [thread:$0]  %s1079_s1, 2048, %s32_s25, [#allocation6], %s908_s11, %s908_s11, %s909_s12  }
  0x14   :  { %s910_s15 = smov [#allocation2]   ;;  %s911_s17 = smov [#allocation7]  }
  0x15   :  { %s22_s16 = sshll.u32 %s910_s15, 4  ;;  %s45_s18 = sshll.u32 %s911_s17, 4  ;;  %s23_s16 = int_to_ptr.vmem [resolvable:$true] %s22_s16  ;;  %s46_s18 = int_to_ptr.vmem [resolvable:$true] %s45_s18 }
  0x16   :  { %s811_s21 = scalar_lea.hbm %s1078_s0, 128 }
  0x17   :  { %p812_p8 = scmp.ne.s32.totalorder %s1078_s0, %s811_s21  ;;  %p815_p9 = scmp.lt.u32.totalorder %s811_s21, %s1078_s0 }
  0x19   :  { %p817_p10 = pnand %p815_p9, %p812_p8 }
  0x1b   :  { %820 = shalt.err (!%p817_p10)
}
  0x1c   :  { %s821_s1 = scalar_lea.vmem %s23_s16, 128  ;;  %p826_p12 = scmp.lt.s32.totalorder %s23_s16, %s23_s16 }
  0x1d   :  { %p822_p11 = scmp.ne.s32.totalorder %s23_s16, %s821_s1  ;;  %p827_p13 = scmp.lt.s32.totalorder %s821_s1, %s821_s1 }
  0x1f   :  { %p828_p0 = por %p827_p13, %p826_p12 }
  0x21   :  { %p829_p1 = pnand %p828_p0, %p822_p11 }
  0x23   :  { %832 = shalt.err (!%p829_p1)
}
  0x24   :  { %25 = dma.hbm_to_vmem [thread:$0]  %s1078_s0, 128, %s23_s16, [#allocation3]  }
  0x25   :  { %s833_s30 = scalar_lea.hbm %s1081_s3, 4096 }
  0x26   :  { %p834_p2 = scmp.ne.s32.totalorder %s1081_s3, %s833_s30  ;;  %p837_p3 = scmp.lt.u32.totalorder %s833_s30, %s1081_s3 }
  0x28   :  { %p839_p4 = pnand %p837_p3, %p834_p2 }
  0x2a   :  { %842 = shalt.err (!%p839_p4)
}
  0x2b   :  { %s843_s14 = scalar_lea.vmem %s46_s18, 4096  ;;  %p848_p6 = scmp.lt.s32.totalorder %s46_s18, %s46_s18 }
  0x2c   :  { %p844_p5 = scmp.ne.s32.totalorder %s46_s18, %s843_s14  ;;  %p849_p7 = scmp.lt.s32.totalorder %s843_s14, %s843_s14 }
  0x2e   :  { %p850_p8 = por %p849_p7, %p848_p6 }
  0x30   :  { %p851_p9 = pnand %p850_p8, %p844_p5 }
  0x32   :  { %854 = shalt.err (!%p851_p9)
}
  0x33   :  { %51 = dma.hbm_to_vmem [thread:$0]  %s1081_s3, 4096, %s46_s18, [#allocation6], %s908_s11, %s908_s11, %s909_s12  }
  0x34   :  { %s912_s16 = smov [#allocation8]   ;;  %s855_s21 = scalar_lea.hbm %s1083_s5, 2048 }
  0x35   :  { %s59_s17 = sshll.u32 %s912_s16, 4  ;;  %p856_p10 = scmp.ne.s32.totalorder %s1083_s5, %s855_s21  ;;  %s60_s17 = int_to_ptr.vmem [resolvable:$true] %s59_s17 }
  0x36   :  { %p859_p11 = scmp.lt.u32.totalorder %s855_s21, %s1083_s5 }
  0x38   :  { %p861_p12 = pnand %p859_p11, %p856_p10 }
  0x3a   :  { %864 = shalt.err (!%p861_p12)
}
  0x3b   :  { %s865_s1 = scalar_lea.vmem %s60_s17, 2048  ;;  %p870_p0 = scmp.lt.s32.totalorder %s60_s17, %s60_s17 }
  0x3c   :  { %p866_p13 = scmp.ne.s32.totalorder %s60_s17, %s865_s1  ;;  %p871_p1 = scmp.lt.s32.totalorder %s865_s1, %s865_s1 }
  0x3e   :  { %p872_p2 = por %p871_p1, %p870_p0 }
  0x40   :  { %p873_p3 = pnand %p872_p2, %p866_p13 }
  0x42   :  { %876 = shalt.err (!%p873_p3)
}
  0x43   :  { %65 = dma.hbm_to_vmem [thread:$0]  %s1083_s5, 2048, %s60_s17, [#allocation9], %s908_s11, %s908_s11, %s909_s12  }
  0x44   :  { %899 = dma.done.wait [#allocation3], 128  }
  0x45   :  { %900 = vsyncadd [#allocation3], 4294967168 }
  0x46   :  { %901 = dma.done.wait [#allocation6], 6144  }
  0x47   :  { %902 = vsyncadd [#allocation6], 4294961152 }
  0x48   :  { %903 = dma.done.wait [#allocation9], 2048  }
  0x49   :  { %904 = vsyncadd [#allocation9], 4294965248  ;;  %v913_v0 = vmov 0.0|0.0   ;;  %vm914_vm0 = vmmov 0   ;;  %v915_v1 = vmov 0.0   ;;  %v81_v2 = vld [vmem:[#allocation5] sm:$0xff] }
  0x4a   :  { %683 = vmatprep.subr.bf16.mxu0 %v913_v0  ;;  %575 = vmatprep.mubr.msk.f32.mxu0 %vm914_vm0, %v915_v1  ;;  %v82_v3 = vld [vmem:[#allocation5 + $0x8] sm:$0xff]  ;;  %v83_v4 = vld [vmem:[#allocation5 + $0x10] sm:$0xff]  ;;  %v84_v6 = vld [vmem:[#allocation5 + $0x18] sm:$0xff]  ;;  %s916_s30 = smov [#allocation10]  }
  0x4b   :  { %707 = vmatprep.subr.bf16.mxu1 %v913_v0  ;;  %610 = vmatprep.mubr.msk.f32.mxu1 %vm914_vm0, %v915_v1  ;;  %v684_v5 = vpack.c.bf16 %v82_v3, %v81_v2  ;;  %v687_v7 = vpack.c.bf16 %v84_v6, %v83_v4  ;;  %v85_v8 = vld [vmem:[#allocation5 + $0x20] sm:$0xff]  ;;  %v86_v9 = vld [vmem:[#allocation5 + $0x28] sm:$0xff]  ;;  %v177_v12 = vld [vmem:[#allocation7 + $0x10] sm:$0xff]  ;;  %s460_s8 = sshll.u32 %s916_s30, 4  ;;  %s461_s8 = int_to_ptr.vmem [resolvable:$true] %s460_s8 }
  0x4c   :  { %v175_v10 = vld [vmem:[#allocation7] sm:$0xff]  ;;  %v176_v11 = vld [vmem:[#allocation7 + $0x8] sm:$0xff]  ;;  %v178_v13 = vld [vmem:[#allocation7 + $0x18] sm:$0xff]  ;;  %v690_v14 = vpack.c.bf16 %v86_v9, %v85_v8  ;;  %s877_s9 = scalar_lea.vmem %s461_s8, 128  ;;  %p882_p5 = scmp.lt.s32.totalorder %s461_s8, %s461_s8 }
  0x4d   :  { %685 = vmatpush3.bf16.msra.mxu0 %v684_v5  ;;  %v708_v15 = vpack.c.bf16 %v176_v11, %v175_v10  ;;  %v87_v16 = vld [vmem:[#allocation5 + $0x30] sm:$0xff]  ;;  %v88_v17 = vld [vmem:[#allocation5 + $0x38] sm:$0xff]  ;;  %v711_v18 = vpack.c.bf16 %v178_v13, %v177_v12  ;;  %v179_v19 = vld [vmem:[#allocation7 + $0x20] sm:$0xff]  ;;  %p878_p4 = scmp.ne.s32.totalorder %s461_s8, %s877_s9  ;;  %p883_p6 = scmp.lt.s32.totalorder %s877_s9, %s877_s9 }
  0x4e   :  { %686 = vmatprep.subr.bf16.mxu0 %v913_v0  ;;  %v180_v20 = vld [vmem:[#allocation7 + $0x28] sm:$0xff]  ;;  %v693_v21 = vpack.c.bf16 %v88_v17, %v87_v16  ;;  %v89_v22 = vld [vmem:[#allocation5 + $0x40] sm:$0xff]  ;;  %v181_v25 = vld [vmem:[#allocation7 + $0x30] sm:$0xff] }
  0x4f   :  { %709 = vmatpush3.bf16.msra.mxu1 %v708_v15  ;;  %v90_v23 = vld [vmem:[#allocation5 + $0x48] sm:$0xff]  ;;  %v714_v24 = vpack.c.bf16 %v180_v20, %v179_v19  ;;  %v182_v26 = vld [vmem:[#allocation7 + $0x38] sm:$0xff]  ;;  %v91_v28 = vld [vmem:[#allocation5 + $0x50] sm:$0xff]  ;;  %p884_p7 = por %p883_p6, %p882_p5 }
  0x50   :  { %710 = vmatprep.subr.bf16.mxu1 %v913_v0  ;;  %v696_v27 = vpack.c.bf16 %v90_v23, %v89_v22  ;;  %v92_v29 = vld [vmem:[#allocation5 + $0x58] sm:$0xff]  ;;  %v717_v30 = vpack.c.bf16 %v182_v26, %v181_v25  ;;  %v183_v31 = vld [vmem:[#allocation7 + $0x40] sm:$0xff]  ;;  %v184_v32 = vld [vmem:[#allocation7 + $0x48] sm:$0xff] }
  0x51   :  { %688 = vmatpush3.bf16.msra.mxu0 %v687_v7  ;;  %v699_v33 = vpack.c.bf16 %v92_v29, %v91_v28  ;;  %v93_v34 = vld [vmem:[#allocation5 + $0x60] sm:$0xff]  ;;  %v94_v35 = vld [vmem:[#allocation5 + $0x68] sm:$0xff]  ;;  %v720_v36 = vpack.c.bf16 %v184_v32, %v183_v31  ;;  %v185_v37 = vld [vmem:[#allocation7 + $0x50] sm:$0xff]  ;;  %p885_p8 = pnand %p884_p7, %p878_p4 }
  0x52   :  { %689 = vmatprep.subr.bf16.mxu0 %v913_v0  ;;  %v186_v38 = vld [vmem:[#allocation7 + $0x58] sm:$0xff]  ;;  %v702_v39 = vpack.c.bf16 %v94_v35, %v93_v34  ;;  %v95_v40 = vld [vmem:[#allocation5 + $0x70] sm:$0xff]  ;;  %v187_v43 = vld [vmem:[#allocation7 + $0x60] sm:$0xff] }
  0x53   :  { %712 = vmatpush3.bf16.msra.mxu1 %v711_v18  ;;  %v96_v41 = vld [vmem:[#allocation5 + $0x78] sm:$0xff]  ;;  %v723_v42 = vpack.c.bf16 %v186_v38, %v185_v37  ;;  %v188_v44 = vld [vmem:[#allocation7 + $0x68] sm:$0xff]  ;;  %v189_v48 = vld [vmem:[#allocation7 + $0x70] sm:$0xff] }
  0x54   :  { %713 = vmatprep.subr.bf16.mxu1 %v913_v0  ;;  %v705_v45 = vpack.c.bf16 %v96_v41, %v95_v40  ;;  %v726_v46 = vpack.c.bf16 %v188_v44, %v187_v43  ;;  %v80_v47 = vld [vmem:[#allocation2] sm:$0xff]  ;;  %v268_v51 = vld [vmem:[#allocation7 + $0x80] sm:$0xff]  ;;  %v269_v52 = vld [vmem:[#allocation7 + $0x88] sm:$0xff] }
  0x55   :  { %691 = vmatpush3.bf16.msra.mxu0 %v690_v14  ;;  %v190_v49 = vld [vmem:[#allocation7 + $0x78] sm:$0xff]  ;;  %v270_v53 = vld [vmem:[#allocation7 + $0x90] sm:$0xff]  ;;  %v732_v54 = vpack.c.bf16 %v269_v52, %v268_v51  ;;  %v272_v57 = vld [vmem:[#allocation7 + $0xa0] sm:$0xff] }
  0x56   :  { %692 = vmatprep.subr.bf16.mxu0 %v913_v0  ;;  %v729_v50 = vpack.c.bf16 %v190_v49, %v189_v48  ;;  %v271_v55 = vld [vmem:[#allocation7 + $0x98] sm:$0xff]  ;;  %v273_v58 = vld [vmem:[#allocation7 + $0xa8] sm:$0xff]  ;;  %v274_v60 = vld [vmem:[#allocation7 + $0xb0] sm:$0xff] }
  0x57   :  { %715 = vmatpush3.bf16.msra.mxu1 %v714_v24  ;;  %v735_v56 = vpack.c.bf16 %v271_v55, %v270_v53  ;;  %v738_v59 = vpack.c.bf16 %v273_v58, %v272_v57  ;;  %v275_v61 = vld [vmem:[#allocation7 + $0xb8] sm:$0xff]  ;;  %v276_v63 = vld [vmem:[#allocation7 + $0xc0] sm:$0xff]  ;;  %v277_v2 = vld [vmem:[#allocation7 + $0xc8] sm:$0xff] }
  0x58   :  { %716 = vmatprep.subr.bf16.mxu1 %v913_v0  ;;  %v741_v62 = vpack.c.bf16 %v275_v61, %v274_v60  ;;  %v744_v3 = vpack.c.bf16 %v277_v2, %v276_v63  ;;  %v278_v4 = vld [vmem:[#allocation7 + $0xd0] sm:$0xff]  ;;  %v279_v5 = vld [vmem:[#allocation7 + $0xd8] sm:$0xff]  ;;  %v280_v7 = vld [vmem:[#allocation7 + $0xe0] sm:$0xff] }
  0x59   :  { %694 = vmatpush3.bf16.msra.mxu0 %v693_v21  ;;  %v747_v6 = vpack.c.bf16 %v279_v5, %v278_v4  ;;  %v281_v8 = vld [vmem:[#allocation7 + $0xe8] sm:$0xff]  ;;  %v471_v10 = vld [vmem:[%s1080_s2] ss:$0 sm:$0xff]  ;;  %v282_v15 = vld [vmem:[#allocation7 + $0xf0] sm:$0xff] }
  0x5a   :  { %695 = vmatprep.subr.bf16.mxu0 %v913_v0  ;;  %v750_v9 = vpack.c.bf16 %v281_v8, %v280_v7  ;;  %v283_v16 = vld [vmem:[#allocation7 + $0xf8] sm:$0xff]  ;;  %v360_v18 = vld [vmem:[#allocation8] sm:$0xff]  ;;  %v361_v19 = vld [vmem:[#allocation8 + $0x8] sm:$0xff] }
  0x5b   :  { %718 = vmatpush3.bf16.msra.mxu1 %v717_v30  ;;  %v753_v17 = vpack.c.bf16 %v283_v16, %v282_v15  ;;  %v362_v20 = vld [vmem:[#allocation8 + $0x10] sm:$0xff]  ;;  %v756_v21 = vpack.c.bf16 %v361_v19, %v360_v18  ;;  %v363_v22 = vld [vmem:[#allocation8 + $0x18] sm:$0xff]  ;;  %v364_v24 = vld [vmem:[#allocation8 + $0x20] sm:$0xff] }
  0x5c   :  { %719 = vmatprep.subr.bf16.mxu1 %v913_v0  ;;  %v759_v23 = vpack.c.bf16 %v363_v22, %v362_v20  ;;  %v365_v25 = vld [vmem:[#allocation8 + $0x28] sm:$0xff]  ;;  %v368_v29 = vld [vmem:[#allocation8 + $0x40] sm:$0xff]  ;;  %v370_v32 = vld [vmem:[#allocation8 + $0x50] sm:$0xff] }
  0x5d   :  { %697 = vmatpush3.bf16.msra.mxu0 %v696_v27  ;;  %v762_v26 = vpack.c.bf16 %v365_v25, %v364_v24  ;;  %v367_v27 = vld [vmem:[#allocation8 + $0x38] sm:$0xff]  ;;  %v369_v30 = vld [vmem:[#allocation8 + $0x48] sm:$0xff]  ;;  %v372_v35 = vld [vmem:[#allocation8 + $0x60] sm:$0xff] }
  0x5e   :  { %698 = vmatprep.subr.bf16.mxu0 %v913_v0  ;;  %v768_v31 = vpack.c.bf16 %v369_v30, %v368_v29  ;;  %v472_v38 = vld [vmem:[%s1082_s4] ss:$0 sm:$0xff]  ;;  %v374_v43 = vld [vmem:[#allocation8 + $0x70] sm:$0xff] }
  0x5f   :  { %721 = vmatpush3.bf16.msra.mxu1 %v720_v36  ;;  %v373_v36 = vld [vmem:[#allocation8 + $0x68] sm:$0xff]  ;;  %v375_v44 = vld [vmem:[#allocation8 + $0x78] sm:$0xff] }
  0x60   :  { %722 = vmatprep.subr.bf16.mxu1 %v913_v0  ;;  %v774_v37 = vpack.c.bf16 %v373_v36, %v372_v35 }
  0x61   :  { %700 = vmatpush3.bf16.msra.mxu0 %v699_v33  ;;  %v371_v33 = vld [vmem:[#allocation8 + $0x58] sm:$0xff] }
  0x62   :  { %701 = vmatprep.subr.bf16.mxu0 %v913_v0  ;;  %v771_v34 = vpack.c.bf16 %v371_v33, %v370_v32 }
  0x63   :  { %724 = vmatpush3.bf16.msra.mxu1 %v723_v42 }
  0x64   :  { %725 = vmatprep.subr.bf16.mxu1 %v913_v0 }
  0x65   :  { %703 = vmatpush3.bf16.msra.mxu0 %v702_v39 }
  0x66   :  { %704 = vmatprep.subr.bf16.mxu0 %v913_v0 }
  0x67   :  { %727 = vmatpush3.bf16.msra.mxu1 %v726_v46  ;;  %v473_v46 = vld [vmem:[%s1082_s4 + $0x1] ss:$0 sm:$0xff] }
  0x68   :  { %728 = vmatprep.subr.bf16.mxu1 %v913_v0 }
  0x69   :  { %706 = vmatpush3.bf16.msra.mxu0 %v705_v45  ;;  %v777_v45 = vpack.c.bf16 %v375_v44, %v374_v43 }
  0x6a   :  { %731 = vmatprep.subr.bf16.mxu0 %v913_v0 }
  0x6b   :  { %730 = vmatpush3.bf16.msra.mxu1 %v729_v50  ;;  %v474_v50 = vld [vmem:[%s1084_s6] ss:$0 sm:$0xff] }
  0x6c   :  { %576 = vmatmul.mubr.f32.vlgmr.msra.gmra.mrb[0].mxu0 %v80_v47  ;;  %755 = vmatprep.subr.bf16.mxu1 %v913_v0 }
  0x6d   :  { %645 = vmatprep.mubr.msk.f32.mxu0 %vm914_vm0, %v915_v1  ;;  %733 = vmatpush3.bf16.msra.mxu0 %v732_v54 }
  0x6e   :  { %734 = vmatprep.subr.bf16.mxu0 %v913_v0 }
  0x71   :  { %736 = vmatpush3.bf16.msra.mxu0 %v735_v56 }
  0x72   :  { %737 = vmatprep.subr.bf16.mxu0 %v913_v0 }
  0x75   :  { %739 = vmatpush3.bf16.msra.mxu0 %v738_v59 }
  0x76   :  { %740 = vmatprep.subr.bf16.mxu0 %v913_v0 }
  0x79   :  { %742 = vmatpush3.bf16.msra.mxu0 %v741_v62 }
  0x7a   :  { %743 = vmatprep.subr.bf16.mxu0 %v913_v0 }
  0x7d   :  { %745 = vmatpush3.bf16.msra.mxu0 %v744_v3 }
  0x7e   :  { %746 = vmatprep.subr.bf16.mxu0 %v913_v0 }
  0x81   :  { %748 = vmatpush3.bf16.msra.mxu0 %v747_v6 }
  0x82   :  { %749 = vmatprep.subr.bf16.mxu0 %v913_v0 }
  0x85   :  { %751 = vmatpush3.bf16.msra.mxu0 %v750_v9 }
  0x86   :  { %752 = vmatprep.subr.bf16.mxu0 %v913_v0 }
  0x89   :  { %754 = vmatpush3.bf16.msra.mxu0 %v753_v17 }
 0x13f   :  { %v170_v11 = vpop.f32.mrb[0].mxu0 }
 0x140   :  { %v171_v12 = vadd.f32 %v471_v10, %v170_v11  ;;  %v577_v13 = vpop.f32.mrb[1].mxu0 }
 0x142   :  { %v174_v14 = vmax.f32 %v171_v12, 0.0 }
 0x144   :  { %611 = vmatmul.mubr.f32.vlgmr.msra.gmra.mrb[0].mxu1 %v174_v14 }
 0x145   :  { %680 = vmatprep.mubr.msk.f32.mxu1 %vm914_vm0, %v915_v1  ;;  %757 = vmatpush3.bf16.msra.mxu1 %v756_v21  ;;  %v366_v1 = vld [vmem:[#allocation8 + $0x30] sm:$0xff] }
 0x146   :  { %758 = vmatprep.subr.bf16.mxu1 %v913_v0  ;;  %v765_v28 = vpack.c.bf16 %v367_v27, %v366_v1 }
 0x149   :  { %760 = vmatpush3.bf16.msra.mxu1 %v759_v23 }
 0x14a   :  { %761 = vmatprep.subr.bf16.mxu1 %v913_v0 }
 0x14d   :  { %763 = vmatpush3.bf16.msra.mxu1 %v762_v26 }
 0x14e   :  { %764 = vmatprep.subr.bf16.mxu1 %v913_v0 }
 0x151   :  { %766 = vmatpush3.bf16.msra.mxu1 %v765_v28 }
 0x152   :  { %767 = vmatprep.subr.bf16.mxu1 %v913_v0 }
 0x155   :  { %769 = vmatpush3.bf16.msra.mxu1 %v768_v31 }
 0x156   :  { %770 = vmatprep.subr.bf16.mxu1 %v913_v0 }
 0x159   :  { %772 = vmatpush3.bf16.msra.mxu1 %v771_v34 }
 0x15a   :  { %773 = vmatprep.subr.bf16.mxu1 %v913_v0 }
 0x15d   :  { %775 = vmatpush3.bf16.msra.mxu1 %v774_v37 }
 0x15e   :  { %776 = vmatprep.subr.bf16.mxu1 %v913_v0 }
 0x161   :  { %778 = vmatpush3.bf16.msra.mxu1 %v777_v45 }
 0x217   :  { %v262_v39 = vpop.f32.mrb[0].mxu1 }
 0x218   :  { %v263_v40 = vadd.f32 %v472_v38, %v262_v39  ;;  %v612_v41 = vpop.f32.mrb[1].mxu1 }
 0x21a   :  { %v266_v42 = vmax.f32 %v263_v40, 0.0 }
 0x21c   :  { %646 = vmatmul.mubr.f32.vlgmr.msra.gmra.mrb[2].mxu0 %v266_v42 }
 0x2ef   :  { %v355_v47 = vpop.f32.mrb[2].mxu0 }
 0x2f0   :  { %v356_v48 = vadd.f32 %v473_v46, %v355_v47  ;;  %v647_v0 = vpop.f32.mrb[3].mxu0 }
 0x2f2   :  { %v359_v49 = vmax.f32 %v356_v48, 0.0 }
 0x2f4   :  { %681 = vmatmul.mubr.f32.vlgmr.msra.gmra.mrb[2].mxu1 %v359_v49 }
 0x3c7   :  { %v449_v51 = vpop.f32.mrb[2].mxu1 }
 0x3c8   :  { %v450_v52 = vadd.f32 %v474_v50, %v449_v51  ;;  %v682_v53 = vpop.f32.mrb[3].mxu1 }
 0x3ca   :  { %453 = vst [vmem:[#allocation10] sm:$0xff] %v450_v52 }
 0x3cb   :  { %888 = shalt.err (!%p885_p8)
}
 0x3cc   :  { %s889_s13 = scalar_lea.hbm %s1085_s7, 128 }
 0x3cd   :  { %p890_p9 = scmp.ne.s32.totalorder %s1085_s7, %s889_s13  ;;  %p893_p10 = scmp.lt.u32.totalorder %s889_s13, %s1085_s7 }
 0x3cf   :  { %p895_p11 = pnand %p893_p10, %p890_p9 }
 0x3d1   :  { %898 = shalt.err (!%p895_p11)
}
 0x3d2   :  { %463 = dma.vmem_to_hbm [thread:$0]  %s461_s8, 128, %s1085_s7, [#allocation4]  }
 0x3d3   :  { %905 = dma.done.wait [#allocation4], 128  }
 0x3d4   :  { %906 = vsyncadd [#allocation4], 4294967168 }
 0x3d5   :  { %467 = vsyncpa [#allocation3], 1 }
 0x3d6   :  { %468 = vsyncpa [#allocation6], 1 }
 0x3d7   :  { %469 = vsyncpa [#allocation9], 1 }
 0x3d8   :  { %470 = vsyncpa [#allocation4], 1 }

</bundles_post_ra>
